<compile_context>
chip_gen: v7x
topology: tpu7x:2x2x1
jax: 0.10.0
libtpu: 0.0.40
codegen_flags: <defaults>
</compile_context>

<pallas_src>
import functools

import jax
import jax.numpy as jnp
from jax.experimental import pallas as pl
from jax.experimental.pallas import tpu as pltpu


_FUSED_VMEM_BYTES = 4 * 1024 * 1024    # raw x bytes threshold for the fused path
_BLOCK_BYTES = 2 * 1024 * 1024         # streaming-path x block byte budget
_VMEM_LIMIT = 32 * 1024 * 1024         # <= scoped/physical VMEM on v5e/v6e/v7x


def _sublane_align(dtype):
    return {4: 8, 2: 16, 1: 32}.get(jnp.dtype(dtype).itemsize, 8)


def _round_up(a, m):
    return ((a + m - 1) // m) * m


# --------------------- fused fast path: stats + apply in one call ---------------------
def _bn_fused_kernel(x_ref, gamma_ref, beta_ref, o_ref, *, n_rows, eps):
    x = x_ref[...].astype(jnp.float32)
    inv_n = 1.0 / n_rows
    mean = jnp.sum(x, axis=0, keepdims=True) * inv_n
    var = jnp.maximum(jnp.sum(x * x, axis=0, keepdims=True) * inv_n - mean * mean, 0.0)
    scale = gamma_ref[...] * jax.lax.rsqrt(var + eps)
    shift = beta_ref[...] - mean * scale
    o_ref[...] = (x * scale + shift).astype(o_ref.dtype)


# --------------------- streaming pass 1: per-channel partial sums ---------------------
def _bn_stats_kernel(x_ref, psum_ref, psq_ref, *,
                     n_rows, tile, steps_per_split, needs_mask):
    k = pl.program_id(1)

    @pl.when(k == 0)
    def _():
        psum_ref[...] = jnp.zeros_like(psum_ref)
        psq_ref[...] = jnp.zeros_like(psq_ref)

    x = x_ref[...].astype(jnp.float32)
    if needs_mask:
        j = pl.program_id(0)
        row0 = (j * steps_per_split + k) * tile
        rows = row0 + jax.lax.broadcasted_iota(jnp.int32, (tile, 1), 0)
        x = jnp.where(rows < n_rows, x, 0.0)

    # (tile, H) -> (tile//8, 8, H): summing over the leading axis is plain vreg
    # adds (VALU), accumulated into the VMEM-resident (8, H) output blocks.
    xr = x.reshape(tile // 8, 8, x.shape[-1])
    psum_ref[...] += jnp.sum(xr, axis=0)
    psq_ref[...] += jnp.sum(xr * xr, axis=0)


# --------------------- streaming pass 2: y = x * scale + shift ---------------------
def _bn_apply_kernel(x_ref, scale_ref, shift_ref, o_ref):
    o_ref[...] = (x_ref[...].astype(jnp.float32) * scale_ref[...]
                  + shift_ref[...]).astype(o_ref.dtype)


def batch_norm_1d(x, gamma, beta, *, eps=1e-5,
                  fused_bytes=_FUSED_VMEM_BYTES,
                  block_bytes=_BLOCK_BYTES,
                  stats_splits=2):
    """Normalization.forward for the 'batch' case: BatchNorm1d over x.view(-1, H)."""
    orig_shape = x.shape
    H = orig_shape[-1]
    x2 = x.reshape(-1, H)
    R = x2.shape[0]
    itemsize = jnp.dtype(x.dtype).itemsize

    gamma2 = gamma.reshape(1, H).astype(jnp.float32)
    beta2 = beta.reshape(1, H).astype(jnp.float32)

    # ---------------- fused VMEM-resident path (small / medium inputs) ----------------
    if R * H * itemsize <= fused_bytes:
        y2 = pl.pallas_call(
            functools.partial(_bn_fused_kernel, n_rows=R, eps=eps),
            out_shape=jax.ShapeDtypeStruct((R, H), x.dtype),
            compiler_params=pltpu.CompilerParams(vmem_limit_bytes=_VMEM_LIMIT),
        )(x2, gamma2, beta2)
        return y2.reshape(orig_shape)

    # ---------------- streaming two-pass path ----------------
    align = _sublane_align(x.dtype)
    bytes_per_row = H * itemsize
    tile = max(align, (block_bytes // bytes_per_row) // align * align)
    tile = min(tile, _round_up(R, align))

    steps_total = pl.cdiv(R, tile)
    splits = stats_splits if steps_total >= stats_splits else 1
    steps_per_split = pl.cdiv(steps_total, splits)
    covered_blocks = splits * steps_per_split
    needs_mask = covered_blocks * tile != R          # ragged tail or duplicated block
    needs_clamp = covered_blocks > steps_total       # some blocks are fully out of range
    last_block = steps_total - 1

    if needs_clamp:
        def x_stats_map(j, k):
            return (jnp.minimum(j * steps_per_split + k, last_block), 0)
    else:
        def x_stats_map(j, k):
            return (j * steps_per_split + k, 0)

    # pass 1: per-split partial sum / sum-of-squares, reduction axis "arbitrary",
    # split axis "parallel" (uses both TensorCores on v7x).
    psum, psq = pl.pallas_call(
        functools.partial(_bn_stats_kernel, n_rows=R, tile=tile,
                          steps_per_split=steps_per_split, needs_mask=needs_mask),
        grid=(splits, steps_per_split),
        in_specs=[pl.BlockSpec((tile, H), x_stats_map)],
        out_specs=(pl.BlockSpec((None, 8, H), lambda j, k: (j, 0, 0)),
                   pl.BlockSpec((None, 8, H), lambda j, k: (j, 0, 0))),
        out_shape=(jax.ShapeDtypeStruct((splits, 8, H), jnp.float32),
                   jax.ShapeDtypeStruct((splits, 8, H), jnp.float32)),
        compiler_params=pltpu.CompilerParams(
            dimension_semantics=("parallel", "arbitrary"),
            vmem_limit_bytes=_VMEM_LIMIT),
    )(x2)

    # finalize in plain JAX (H-sized, negligible): clamped biased variance,
    # gamma/beta folded into a single per-channel scale/shift.
    inv_n = 1.0 / R
    mean = jnp.sum(psum, axis=(0, 1)) * inv_n
    var = jnp.maximum(jnp.sum(psq, axis=(0, 1)) * inv_n - mean * mean, 0.0)
    scale1 = gamma2[0] * jax.lax.rsqrt(var + eps)
    shift1 = beta2[0] - mean * scale1
    scale = scale1.reshape(1, H)
    shift = shift1.reshape(1, H)

    # pass 2: independent row tiles -> "parallel" (megacore sharding on v7x).
    row_spec = pl.BlockSpec((tile, H), lambda i: (i, 0))
    chan_spec = pl.BlockSpec((1, H), lambda i: (0, 0))   # VMEM-resident across grid
    y2 = pl.pallas_call(
        _bn_apply_kernel,
        grid=(steps_total,),
        in_specs=[row_spec, chan_spec, chan_spec],
        out_specs=row_spec,
        out_shape=jax.ShapeDtypeStruct((R, H), x.dtype),
        compiler_params=pltpu.CompilerParams(
            dimension_semantics=("parallel",),
            vmem_limit_bytes=_VMEM_LIMIT),
    )(x2, scale, shift)

    return y2.reshape(orig_shape)


# TODO(synk): the 'instance' branch of Normalization (nn.InstanceNorm1d over the sequence
# axis per sample) and the running-stats buffer update are not implemented; the module
# default and the forward output semantics here are the 'batch' training-mode path.


def _reference_batch_norm(x, gamma, beta, eps=1e-5):
    H = x.shape[-1]
    x2 = x.reshape(-1, H).astype(jnp.float32)
    mean = jnp.mean(x2, axis=0, keepdims=True)
    var = jnp.mean(jnp.square(x2 - mean), axis=0, keepdims=True)
    y = ((x2 - mean) * jax.lax.rsqrt(var + eps) * gamma.reshape(1, H).astype(jnp.float32)
         + beta.reshape(1, H).astype(jnp.float32))
    return y.reshape(x.shape).astype(x.dtype)


if __name__ == "__main__":
    key = jax.random.PRNGKey(0)
    kx, kg, kb, kx2 = jax.random.split(key, 4)

    B, N, H = 2, 128, 128          # (batch, seq, embed_dim) -> lane-dense last dim
    x = jax.random.normal(kx, (B, N, H), jnp.float32)
    stdv = 1.0 / (H ** 0.5)        # matches Normalization.init_parameters
    gamma = jax.random.uniform(kg, (H,), jnp.float32, -stdv, stdv)
    beta = jax.random.uniform(kb, (H,), jnp.float32, -stdv, stdv)

    # 1) fused VMEM-resident fast path (default for this small size).
    y = jax.block_until_ready(batch_norm_1d(x, gamma, beta))
    y_ref = _reference_batch_norm(x, gamma, beta)
    assert y.shape == (B, N, H)
    assert bool(jnp.allclose(y, y_ref, rtol=1e-4, atol=1e-4)), "fused path mismatch"

    # 2) streaming two-pass path with ragged row count (R=200, 96-row tiles):
    #    exercises the 2-way "parallel" stats split, clamped index_map and
    #    in-kernel tail masking.
    x_ragged = jax.random.normal(kx2, (2, 100, H), jnp.float32)
    y2 = jax.block_until_ready(
        batch_norm_1d(x_ragged, gamma, beta,
                      fused_bytes=0, block_bytes=96 * H * 4))
    y2_ref = _reference_batch_norm(x_ragged, gamma, beta)
    assert y2.shape == x_ragged.shape
    assert bool(jnp.allclose(y2, y2_ref, rtol=1e-4, atol=1e-4)), "streaming path mismatch"

    print("KERNEL_OK")
</pallas_src>

<mosaic_0001>
module attributes {stable_mosaic.version = 11 : i64} {
  func.func @_bn_fused_kernel(%arg0: memref<256x128xf32, #tpu.memory_space<vmem>>, %arg1: memref<1x128xf32, #tpu.memory_space<vmem>>, %arg2: memref<1x128xf32, #tpu.memory_space<vmem>>, %arg3: memref<256x128xf32, #tpu.memory_space<vmem>>) attributes {dimension_semantics = [], scalar_prefetch = 0 : i64, scratch_operands = 0 : i64, tpu.core_type = #tpu.core_type<tc>} {
    %c0 = arith.constant 0 : index
    %c0_0 = arith.constant 0 : index
    %0 = vector.load %arg0[%c0, %c0_0] : memref<256x128xf32, #tpu.memory_space<vmem>>, vector<256x128xf32>
    %cst = arith.constant dense<0.000000e+00> : vector<128xf32>
    %1 = vector.multi_reduction <add>, %0, %cst [0] : vector<256x128xf32> to vector<128xf32>
    %2 = vector.shape_cast %1 : vector<128xf32> to vector<1x128xf32>
    %cst_1 = arith.constant 3.906250e-03 : f32
    %3 = vector.broadcast %cst_1 : f32 to vector<1x128xf32>
    %4 = arith.mulf %2, %3 : vector<1x128xf32>
    %5 = arith.mulf %0, %0 : vector<256x128xf32>
    %cst_2 = arith.constant dense<0.000000e+00> : vector<128xf32>
    %6 = vector.multi_reduction <add>, %5, %cst_2 [0] : vector<256x128xf32> to vector<128xf32>
    %7 = vector.shape_cast %6 : vector<128xf32> to vector<1x128xf32>
    %cst_3 = arith.constant 3.906250e-03 : f32
    %8 = vector.broadcast %cst_3 : f32 to vector<1x128xf32>
    %9 = arith.mulf %7, %8 : vector<1x128xf32>
    %10 = arith.mulf %4, %4 : vector<1x128xf32>
    %11 = arith.subf %9, %10 : vector<1x128xf32>
    %cst_4 = arith.constant 0.000000e+00 : f32
    %12 = vector.broadcast %cst_4 : f32 to vector<1x128xf32>
    %13 = arith.maximumf %11, %12 : vector<1x128xf32>
    %c0_5 = arith.constant 0 : index
    %c0_6 = arith.constant 0 : index
    %14 = vector.load %arg1[%c0_5, %c0_6] : memref<1x128xf32, #tpu.memory_space<vmem>>, vector<1x128xf32>
    %cst_7 = arith.constant 9.99999974E-6 : f32
    %15 = vector.broadcast %cst_7 : f32 to vector<1x128xf32>
    %16 = arith.addf %13, %15 : vector<1x128xf32>
    %17 = math.rsqrt %16 : vector<1x128xf32>
    %18 = arith.mulf %14, %17 : vector<1x128xf32>
    %c0_8 = arith.constant 0 : index
    %c0_9 = arith.constant 0 : index
    %19 = vector.load %arg2[%c0_8, %c0_9] : memref<1x128xf32, #tpu.memory_space<vmem>>, vector<1x128xf32>
    %20 = arith.mulf %4, %18 : vector<1x128xf32>
    %21 = arith.subf %19, %20 : vector<1x128xf32>
    %22 = vector.broadcast %18 : vector<1x128xf32> to vector<256x128xf32>
    %23 = arith.mulf %0, %22 : vector<256x128xf32>
    %24 = vector.broadcast %21 : vector<1x128xf32> to vector<256x128xf32>
    %25 = arith.addf %23, %24 : vector<256x128xf32>
    %c0_10 = arith.constant 0 : index
    %c0_11 = arith.constant 0 : index
    %26 = vector.load %arg3[%c0_10, %c0_11] : memref<256x128xf32, #tpu.memory_space<vmem>>, vector<256x128xf32>
    tpu.vector_store %arg3[%c0_10, %c0_11], %25 {strides = array<i32>} : memref<256x128xf32, #tpu.memory_space<vmem>>, vector<256x128xf32>,
    return
  }
}

</mosaic_0001>

<bundles_post_ra>
// kernel: tpu_custom_call.1
= control target key start
LH: loop header
LB: loop body
LE: loop exit
PB: predicated region body
PF: predicated region fallthrough
CT: control target
= control target key end

     0   :  { %8 = vsyncpa [#allocation3], 0  ;;  %s678_s0 = inlined_call_operand.hbm [shape: f32[256,128], index: 0, kind: input, shape index: {}]   ;;  %s679_s1 = inlined_call_operand.vmem [shape: f32[1,128], index: 1, kind: input, shape index: {}]   ;;  %s680_s2 = inlined_call_operand.vmem [shape: f32[1,128], index: 2, kind: input, shape index: {}]   ;;  %s681_s3 = inlined_call_operand.hbm [shape: f32[256,128], index: 3, kind: output, shape index: {}]  }
   0x1   :  { %9 = vsyncpa [#allocation4], 0  ;;  %s358_s12 = smov [#allocation2]   ;;  %s310_s16 = scalar_lea.hbm %s678_s0, 4096 }
   0x2   :  { %s15_s13 = sshll.u32 %s358_s12, 4  ;;  %p311_p0 = scmp.ne.s32.totalorder %s678_s0, %s310_s16  ;;  %s16_s13 = int_to_ptr.vmem [resolvable:$true] %s15_s13 }
   0x3   :  { %p314_p1 = scmp.lt.u32.totalorder %s310_s16, %s678_s0 }
   0x5   :  { %p316_p2 = pnand %p314_p1, %p311_p0 }
   0x7   :  { %319 = shalt.err (!%p316_p2)
}
   0x8   :  { %s320_s21 = scalar_lea.vmem %s16_s13, 4096  ;;  %p325_p4 = scmp.lt.s32.totalorder %s16_s13, %s16_s13 }
   0x9   :  { %p321_p3 = scmp.ne.s32.totalorder %s16_s13, %s320_s21  ;;  %p326_p5 = scmp.lt.s32.totalorder %s320_s21, %s320_s21 }
   0xb   :  { %p327_p6 = por %p326_p5, %p325_p4 }
   0xd   :  { %p328_p7 = pnand %p327_p6, %p321_p3 }
   0xf   :  { %331 = shalt.err (!%p328_p7)
}
  0x10   :  { %s359_s22 = smov 128   ;;  %s360_s23 = smov 8  }
  0x11   :  { %21 = dma.hbm_to_vmem [thread:$0]  %s678_s0, 4096, %s16_s13, [#allocation3], %s359_s22, %s359_s22, %s360_s23  }
  0x12   :  { %354 = dma.done.wait [#allocation3], 4096  }
  0x13   :  { %355 = vsyncadd [#allocation3], 4294963200  ;;  %v397_v0 = vld [vmem:[#allocation2] sm:$0xff]  ;;  %v399_v1 = vld [vmem:[#allocation2 + $0x8] sm:$0xff] }
  0x14   :  { %v401_v2 = vld [vmem:[#allocation2 + $0x10] sm:$0xff]  ;;  %v403_v3 = vld [vmem:[#allocation2 + $0x18] sm:$0xff]  ;;  %v61_v4 = vadd.f32 %v399_v1, %v397_v0  ;;  %v99_v5 = vmul.f32 %v397_v0, %v397_v0  ;;  %v100_v6 = vmul.f32 %v399_v1, %v399_v1  ;;  %v413_v8 = vld [vmem:[#allocation2 + $0x20] sm:$0xff] }
  0x15   :  { %v101_v7 = vmul.f32 %v401_v2, %v401_v2  ;;  %v102_v10 = vmul.f32 %v403_v3, %v403_v3  ;;  %v418_v12 = vld [vmem:[#allocation2 + $0x28] sm:$0xff]  ;;  %v103_v14 = vmul.f32 %v413_v8, %v413_v8  ;;  %v423_v16 = vld [vmem:[#allocation2 + $0x30] sm:$0xff]  ;;  %v428_v20 = vld [vmem:[#allocation2 + $0x38] sm:$0xff] }
  0x16   :  { %v62_v9 = vadd.f32 %v61_v4, %v401_v2  ;;  %v131_v11 = vadd.f32 %v100_v6, %v99_v5  ;;  %v104_v18 = vmul.f32 %v418_v12, %v418_v12  ;;  %v105_v22 = vmul.f32 %v423_v16, %v423_v16  ;;  %v433_v24 = vld [vmem:[#allocation2 + $0x40] sm:$0xff]  ;;  %v438_v28 = vld [vmem:[#allocation2 + $0x48] sm:$0xff]  ;;  %v443_v32 = vld [vmem:[#allocation2 + $0x50] sm:$0xff] }
  0x17   :  { %v106_v26 = vmul.f32 %v428_v20, %v428_v20  ;;  %v107_v30 = vmul.f32 %v433_v24, %v433_v24  ;;  %v108_v34 = vmul.f32 %v438_v28, %v438_v28  ;;  %v448_v36 = vld [vmem:[#allocation2 + $0x58] sm:$0xff]  ;;  %v109_v38 = vmul.f32 %v443_v32, %v443_v32  ;;  %v453_v40 = vld [vmem:[#allocation2 + $0x60] sm:$0xff]  ;;  %v458_v44 = vld [vmem:[#allocation2 + $0x68] sm:$0xff] }
  0x18   :  { %v63_v13 = vadd.f32 %v62_v9, %v403_v3  ;;  %v132_v15 = vadd.f32 %v131_v11, %v101_v7  ;;  %v110_v42 = vmul.f32 %v448_v36, %v448_v36  ;;  %v111_v46 = vmul.f32 %v453_v40, %v453_v40  ;;  %v463_v48 = vld [vmem:[#allocation2 + $0x70] sm:$0xff]  ;;  %v468_v52 = vld [vmem:[#allocation2 + $0x78] sm:$0xff]  ;;  %v473_v56 = vld [vmem:[#allocation2 + $0x80] sm:$0xff] }
  0x19   :  { %v112_v50 = vmul.f32 %v458_v44, %v458_v44  ;;  %v113_v54 = vmul.f32 %v463_v48, %v463_v48  ;;  %v114_v58 = vmul.f32 %v468_v52, %v468_v52  ;;  %v478_v60 = vld [vmem:[#allocation2 + $0x88] sm:$0xff]  ;;  %v115_v62 = vmul.f32 %v473_v56, %v473_v56  ;;  %v483_v4 = vld [vmem:[#allocation2 + $0x90] sm:$0xff]  ;;  %v488_v9 = vld [vmem:[#allocation2 + $0x98] sm:$0xff] }
  0x1a   :  { %v64_v17 = vadd.f32 %v63_v13, %v413_v8  ;;  %v133_v19 = vadd.f32 %v132_v15, %v102_v10  ;;  %v116_v6 = vmul.f32 %v478_v60, %v478_v60  ;;  %v117_v11 = vmul.f32 %v483_v4, %v483_v4 }
  0x1c   :  { %v65_v21 = vadd.f32 %v64_v17, %v418_v12  ;;  %v134_v23 = vadd.f32 %v133_v19, %v103_v14  ;;  %v493_v14 = vld [vmem:[#allocation2 + $0xa0] sm:$0xff]  ;;  %v118_v17 = vmul.f32 %v488_v9, %v488_v9  ;;  %v498_v19 = vld [vmem:[#allocation2 + $0xa8] sm:$0xff] }
  0x1e   :  { %v66_v25 = vadd.f32 %v65_v21, %v423_v16  ;;  %v135_v27 = vadd.f32 %v134_v23, %v104_v18 }
  0x20   :  { %v67_v29 = vadd.f32 %v66_v25, %v428_v20  ;;  %v136_v31 = vadd.f32 %v135_v27, %v105_v22  ;;  %v119_v22 = vmul.f32 %v493_v14, %v493_v14  ;;  %v503_v25 = vld [vmem:[#allocation2 + $0xb0] sm:$0xff]  ;;  %v120_v27 = vmul.f32 %v498_v19, %v498_v19 }
  0x22   :  { %v68_v33 = vadd.f32 %v67_v29, %v433_v24  ;;  %v137_v35 = vadd.f32 %v136_v31, %v106_v26 }
  0x24   :  { %v69_v37 = vadd.f32 %v68_v33, %v438_v28  ;;  %v138_v39 = vadd.f32 %v137_v35, %v107_v30  ;;  %v508_v30 = vld [vmem:[#allocation2 + $0xb8] sm:$0xff]  ;;  %v121_v33 = vmul.f32 %v503_v25, %v503_v25  ;;  %v513_v35 = vld [vmem:[#allocation2 + $0xc0] sm:$0xff] }
  0x26   :  { %v70_v41 = vadd.f32 %v69_v37, %v443_v32  ;;  %v139_v43 = vadd.f32 %v138_v39, %v108_v34 }
  0x28   :  { %v71_v45 = vadd.f32 %v70_v41, %v448_v36  ;;  %v140_v47 = vadd.f32 %v139_v43, %v109_v38  ;;  %v122_v38 = vmul.f32 %v508_v30, %v508_v30  ;;  %v518_v41 = vld [vmem:[#allocation2 + $0xc8] sm:$0xff]  ;;  %v123_v43 = vmul.f32 %v513_v35, %v513_v35 }
  0x2a   :  { %v72_v49 = vadd.f32 %v71_v45, %v453_v40  ;;  %v141_v51 = vadd.f32 %v140_v47, %v110_v42 }
  0x2c   :  { %v73_v53 = vadd.f32 %v72_v49, %v458_v44  ;;  %v142_v55 = vadd.f32 %v141_v51, %v111_v46  ;;  %v523_v46 = vld [vmem:[#allocation2 + $0xd0] sm:$0xff]  ;;  %v124_v49 = vmul.f32 %v518_v41, %v518_v41  ;;  %v528_v51 = vld [vmem:[#allocation2 + $0xd8] sm:$0xff] }
  0x2e   :  { %v74_v57 = vadd.f32 %v73_v53, %v463_v48  ;;  %v143_v59 = vadd.f32 %v142_v55, %v112_v50 }
  0x30   :  { %v75_v61 = vadd.f32 %v74_v57, %v468_v52  ;;  %v144_v63 = vadd.f32 %v143_v59, %v113_v54  ;;  %v125_v54 = vmul.f32 %v523_v46, %v523_v46  ;;  %v533_v57 = vld [vmem:[#allocation2 + $0xe0] sm:$0xff]  ;;  %v126_v59 = vmul.f32 %v528_v51, %v528_v51 }
  0x32   :  { %v76_v5 = vadd.f32 %v75_v61, %v473_v56  ;;  %v145_v7 = vadd.f32 %v144_v63, %v114_v58 }
  0x34   :  { %v77_v10 = vadd.f32 %v76_v5, %v478_v60  ;;  %v146_v13 = vadd.f32 %v145_v7, %v115_v62  ;;  %v538_v62 = vld [vmem:[#allocation2 + $0xe8] sm:$0xff]  ;;  %v127_v5 = vmul.f32 %v533_v57, %v533_v57  ;;  %v543_v7 = vld [vmem:[#allocation2 + $0xf0] sm:$0xff] }
  0x36   :  { %v78_v15 = vadd.f32 %v77_v10, %v483_v4  ;;  %v147_v18 = vadd.f32 %v146_v13, %v116_v6 }
  0x38   :  { %v79_v21 = vadd.f32 %v78_v15, %v488_v9  ;;  %v148_v23 = vadd.f32 %v147_v18, %v117_v11  ;;  %v128_v11 = vmul.f32 %v538_v62, %v538_v62  ;;  %v548_v15 = vld [vmem:[#allocation2 + $0xf8] sm:$0xff]  ;;  %v129_v18 = vmul.f32 %v543_v7, %v543_v7 }
  0x3a   :  { %v80_v26 = vadd.f32 %v79_v21, %v493_v14  ;;  %v149_v29 = vadd.f32 %v148_v23, %v118_v17  ;;  %v130_v23 = vmul.f32 %v548_v15, %v548_v15 }
  0x3c   :  { %v81_v31 = vadd.f32 %v80_v26, %v498_v19  ;;  %v150_v34 = vadd.f32 %v149_v29, %v119_v22 }
  0x3e   :  { %v82_v37 = vadd.f32 %v81_v31, %v503_v25  ;;  %v151_v39 = vadd.f32 %v150_v34, %v120_v27 }
  0x40   :  { %v83_v42 = vadd.f32 %v82_v37, %v508_v30  ;;  %v152_v45 = vadd.f32 %v151_v39, %v121_v33 }
  0x42   :  { %v84_v47 = vadd.f32 %v83_v42, %v513_v35  ;;  %v153_v50 = vadd.f32 %v152_v45, %v122_v38 }
  0x44   :  { %v85_v53 = vadd.f32 %v84_v47, %v518_v41  ;;  %v154_v55 = vadd.f32 %v153_v50, %v123_v43 }
  0x46   :  { %v86_v58 = vadd.f32 %v85_v53, %v523_v46  ;;  %v155_v61 = vadd.f32 %v154_v55, %v124_v49 }
  0x48   :  { %v87_v63 = vadd.f32 %v86_v58, %v528_v51  ;;  %v156_v6 = vadd.f32 %v155_v61, %v125_v54 }
  0x4a   :  { %v88_v10 = vadd.f32 %v87_v63, %v533_v57  ;;  %v157_v13 = vadd.f32 %v156_v6, %v126_v59 }
  0x4c   :  { %v89_v17 = vadd.f32 %v88_v10, %v538_v62  ;;  %v158_v21 = vadd.f32 %v157_v13, %v127_v5  ;;  %v180_v5 = vlaneseq  ;;  %v172_v10 = vld [vmem:[%s679_s1] sm:$0x1]  ;;  %s361_s1 = smov [#allocation5]  }
  0x4e   :  { %v90_v22 = vadd.f32 %v89_v17, %v543_v7  ;;  %v159_v26 = vadd.f32 %v158_v21, %v128_v11  ;;  %v181_v6 = vshrl.u32 %v180_v5, 7 }
  0x50   :  { %v91_v27 = vadd.f32 %v90_v22, %v548_v15  ;;  %v160_v29 = vadd.f32 %v159_v26, %v129_v18  ;;  %v182_v11 = vsub.s32 0, %v181_v6  ;;  %v176_v18 = vld [vmem:[%s680_s2] sm:$0x1]  ;;  %s292_s2 = sshll.u32 %s361_s1, 4  ;;  %s293_s2 = int_to_ptr.vmem [resolvable:$true] %s292_s2 }
  0x51   :  { %s332_s29 = scalar_lea.vmem %s293_s2, 4096  ;;  %p337_p9 = scmp.lt.s32.totalorder %s293_s2, %s293_s2 }
  0x52   :  { %v92_v31 = vrot.slane %v91_v27, 4  ;;  %v161_v33 = vadd.f32 %v160_v29, %v130_v23  ;;  %p333_p8 = scmp.ne.s32.totalorder %s293_s2, %s332_s29  ;;  %p338_p10 = scmp.lt.s32.totalorder %s332_s29, %s332_s29 }
  0x54   :  { %v93_v34 = vadd.f32 %v92_v31, %v91_v27  ;;  %v162_v37 = vrot.slane %v161_v33, 4  ;;  %p339_p11 = por %p338_p10, %p337_p9 }
  0x56   :  { %v94_v38 = vrot.slane %v93_v34, 2  ;;  %v163_v39 = vadd.f32 %v162_v37, %v161_v33  ;;  %p340_p12 = pnand %p339_p11, %p333_p8 }
  0x58   :  { %v95_v42 = vadd.f32 %v94_v38, %v93_v34  ;;  %v164_v43 = vrot.slane %v163_v39, 2 }
  0x5a   :  { %v96_v45 = vrot.slane %v95_v42, 1  ;;  %v165_v47 = vadd.f32 %v164_v43, %v163_v39 }
  0x5c   :  { %v97_v49 = vadd.f32 %v96_v45, %v95_v42  ;;  %v166_v50 = vrot.slane %v165_v47, 1 }
  0x5e   :  { %v98_v53 = vmul.f32 0.00390625, %v97_v49  ;;  %v167_v54 = vadd.f32 %v166_v50, %v165_v47 }
  0x60   :  { %v169_v55 = vmul.f32 %v98_v53, %v98_v53  ;;  %v168_v58 = vmul.f32 0.00390625, %v167_v54 }
  0x62   :  { %v170_v59 = vsub.f32 %v168_v58, %v169_v55 }
  0x64   :  { %v171_v61 = vmax.f32 %v170_v59, 0.0 }
  0x66   :  { %v173_v63 = vadd.f32 1e-05, %v171_v61 }
  0x68   :  { %308 = vrsqrt.f32 %v173_v63 }
  0x72   :  { %v309_v13 = vpop.eup %308 }
  0x73   :  { %v175_v17 = vmul.f32 %v309_v13, %v172_v10 }
  0x75   :  { %v177_v21 = vmul.f32 %v175_v17, %v98_v53  ;;  %v563_v22 = vrot.slane %v175_v17, %v182_v11 }
  0x77   :  { %v178_v23 = vsub.f32 %v176_v18, %v177_v21  ;;  %v185_v26 = vmul.f32 %v563_v22, %v397_v0  ;;  %v186_v27 = vmul.f32 %v563_v22, %v399_v1  ;;  %v187_v29 = vmul.f32 %v563_v22, %v401_v2 }
  0x78   :  { %v188_v31 = vmul.f32 %v563_v22, %v403_v3  ;;  %v189_v33 = vmul.f32 %v563_v22, %v413_v8  ;;  %v190_v34 = vmul.f32 %v563_v22, %v418_v12  ;;  %v191_v37 = vmul.f32 %v563_v22, %v423_v16 }
  0x79   :  { %v579_v38 = vrot.slane %v178_v23, %v182_v11  ;;  %v192_v0 = vmul.f32 %v563_v22, %v428_v20  ;;  %v193_v1 = vmul.f32 %v563_v22, %v433_v24  ;;  %v194_v2 = vmul.f32 %v563_v22, %v438_v28 }
  0x7a   :  { %v195_v3 = vmul.f32 %v563_v22, %v443_v32  ;;  %v196_v8 = vmul.f32 %v563_v22, %v448_v36  ;;  %v197_v12 = vmul.f32 %v563_v22, %v453_v40  ;;  %v198_v16 = vmul.f32 %v563_v22, %v458_v44 }
  0x7b   :  { %v223_v20 = vadd.f32 %v579_v38, %v185_v26  ;;  %v224_v39 = vadd.f32 %v579_v38, %v186_v27  ;;  %v225_v24 = vadd.f32 %v579_v38, %v187_v29  ;;  %v226_v28 = vadd.f32 %v579_v38, %v188_v31 }
  0x7c   :  { %v227_v42 = vadd.f32 %v579_v38, %v189_v33  ;;  %v228_v32 = vadd.f32 %v579_v38, %v190_v34  ;;  %v229_v36 = vadd.f32 %v579_v38, %v191_v37  ;;  %v230_v43 = vadd.f32 %v579_v38, %v192_v0 }
  0x7d   :  { %255 = vst [vmem:[#allocation5] sm:$0xff] %v223_v20  ;;  %256 = vst [vmem:[#allocation5 + $0x8] sm:$0xff] %v224_v39  ;;  %v231_v40 = vadd.f32 %v579_v38, %v193_v1  ;;  %v232_v44 = vadd.f32 %v579_v38, %v194_v2  ;;  %v233_v45 = vadd.f32 %v579_v38, %v195_v3 }
  0x7e   :  { %257 = vst [vmem:[#allocation5 + $0x10] sm:$0xff] %v225_v24  ;;  %258 = vst [vmem:[#allocation5 + $0x18] sm:$0xff] %v226_v28  ;;  %v234_v47 = vadd.f32 %v579_v38, %v196_v8  ;;  %v235_v49 = vadd.f32 %v579_v38, %v197_v12  ;;  %v236_v50 = vadd.f32 %v579_v38, %v198_v16 }
  0x7f   :  { %259 = vst [vmem:[#allocation5 + $0x20] sm:$0xff] %v227_v42  ;;  %260 = vst [vmem:[#allocation5 + $0x28] sm:$0xff] %v228_v32  ;;  %v199_v53 = vmul.f32 %v563_v22, %v463_v48  ;;  %v200_v54 = vmul.f32 %v563_v22, %v468_v52  ;;  %v201_v55 = vmul.f32 %v563_v22, %v473_v56 }
  0x80   :  { %261 = vst [vmem:[#allocation5 + $0x30] sm:$0xff] %v229_v36  ;;  %262 = vst [vmem:[#allocation5 + $0x38] sm:$0xff] %v230_v43  ;;  %v202_v58 = vmul.f32 %v563_v22, %v478_v60  ;;  %v203_v59 = vmul.f32 %v563_v22, %v483_v4  ;;  %v204_v61 = vmul.f32 %v563_v22, %v488_v9 }
  0x81   :  { %263 = vst [vmem:[#allocation5 + $0x40] sm:$0xff] %v231_v40  ;;  %264 = vst [vmem:[#allocation5 + $0x48] sm:$0xff] %v232_v44  ;;  %v237_v48 = vadd.f32 %v579_v38, %v199_v53  ;;  %v238_v52 = vadd.f32 %v579_v38, %v200_v54  ;;  %v205_v63 = vmul.f32 %v563_v22, %v493_v14 }
  0x82   :  { %265 = vst [vmem:[#allocation5 + $0x50] sm:$0xff] %v233_v45  ;;  %266 = vst [vmem:[#allocation5 + $0x58] sm:$0xff] %v234_v47  ;;  %v206_v56 = vmul.f32 %v563_v22, %v498_v19  ;;  %v239_v60 = vadd.f32 %v579_v38, %v201_v55  ;;  %v240_v5 = vadd.f32 %v579_v38, %v202_v58 }
  0x83   :  { %267 = vst [vmem:[#allocation5 + $0x60] sm:$0xff] %v235_v49  ;;  %268 = vst [vmem:[#allocation5 + $0x68] sm:$0xff] %v236_v50  ;;  %v241_v4 = vadd.f32 %v579_v38, %v203_v59  ;;  %v242_v9 = vadd.f32 %v579_v38, %v204_v61  ;;  %v243_v6 = vadd.f32 %v579_v38, %v205_v63 }
  0x84   :  { %269 = vst [vmem:[#allocation5 + $0x70] sm:$0xff] %v237_v48  ;;  %270 = vst [vmem:[#allocation5 + $0x78] sm:$0xff] %v238_v52  ;;  %v244_v10 = vadd.f32 %v579_v38, %v206_v56  ;;  %v207_v14 = vmul.f32 %v563_v22, %v503_v25  ;;  %v208_v19 = vmul.f32 %v563_v22, %v508_v30 }
  0x85   :  { %271 = vst [vmem:[#allocation5 + $0x80] sm:$0xff] %v239_v60  ;;  %272 = vst [vmem:[#allocation5 + $0x88] sm:$0xff] %v240_v5  ;;  %v209_v11 = vmul.f32 %v563_v22, %v513_v35  ;;  %v210_v13 = vmul.f32 %v563_v22, %v518_v41  ;;  %v211_v17 = vmul.f32 %v563_v22, %v523_v46 }
  0x86   :  { %273 = vst [vmem:[#allocation5 + $0x90] sm:$0xff] %v241_v4  ;;  %274 = vst [vmem:[#allocation5 + $0x98] sm:$0xff] %v242_v9  ;;  %v212_v18 = vmul.f32 %v563_v22, %v528_v51  ;;  %v245_v25 = vadd.f32 %v579_v38, %v207_v14  ;;  %v246_v30 = vadd.f32 %v579_v38, %v208_v19 }
  0x87   :  { %275 = vst [vmem:[#allocation5 + $0xa0] sm:$0xff] %v243_v6  ;;  %276 = vst [vmem:[#allocation5 + $0xa8] sm:$0xff] %v244_v10  ;;  %v213_v21 = vmul.f32 %v563_v22, %v533_v57  ;;  %v214_v35 = vmul.f32 %v563_v22, %v538_v62  ;;  %v247_v41 = vadd.f32 %v579_v38, %v209_v11 }
  0x88   :  { %v248_v23 = vadd.f32 %v579_v38, %v210_v13  ;;  %v249_v46 = vadd.f32 %v579_v38, %v211_v17  ;;  %v250_v51 = vadd.f32 %v579_v38, %v212_v18  ;;  %277 = vst [vmem:[#allocation5 + $0xb0] sm:$0xff] %v245_v25  ;;  %278 = vst [vmem:[#allocation5 + $0xb8] sm:$0xff] %v246_v30 }
  0x89   :  { %v251_v26 = vadd.f32 %v579_v38, %v213_v21  ;;  %v252_v27 = vadd.f32 %v579_v38, %v214_v35  ;;  %v215_v57 = vmul.f32 %v563_v22, %v543_v7  ;;  %v216_v62 = vmul.f32 %v563_v22, %v548_v15  ;;  %279 = vst [vmem:[#allocation5 + $0xc0] sm:$0xff] %v247_v41 }
  0x8a   :  { %280 = vst [vmem:[#allocation5 + $0xc8] sm:$0xff] %v248_v23  ;;  %281 = vst [vmem:[#allocation5 + $0xd0] sm:$0xff] %v249_v46 }
  0x8b   :  { %282 = vst [vmem:[#allocation5 + $0xd8] sm:$0xff] %v250_v51  ;;  %283 = vst [vmem:[#allocation5 + $0xe0] sm:$0xff] %v251_v26  ;;  %v253_v29 = vadd.f32 %v579_v38, %v215_v57  ;;  %v254_v31 = vadd.f32 %v579_v38, %v216_v62 }
  0x8c   :  { %284 = vst [vmem:[#allocation5 + $0xe8] sm:$0xff] %v252_v27 }
  0x8d   :  { %285 = vst [vmem:[#allocation5 + $0xf0] sm:$0xff] %v253_v29  ;;  %286 = vst [vmem:[#allocation5 + $0xf8] sm:$0xff] %v254_v31 }
  0x8e   :  { %343 = shalt.err (!%p340_p12)
}
  0x8f   :  { %s344_s5 = scalar_lea.hbm %s681_s3, 4096 }
  0x90   :  { %p345_p13 = scmp.ne.s32.totalorder %s681_s3, %s344_s5  ;;  %p348_p0 = scmp.lt.u32.totalorder %s344_s5, %s681_s3 }
  0x92   :  { %p350_p1 = pnand %p348_p0, %p345_p13 }
  0x94   :  { %353 = shalt.err (!%p350_p1)
}
  0x95   :  { %298 = dma.vmem_to_hbm [thread:$0]  %s293_s2, 4096, %s681_s3, [#allocation4], %s359_s22, %s359_s22, %s360_s23  }
  0x96   :  { %356 = dma.done.wait [#allocation4], 4096  }
  0x97   :  { %357 = vsyncadd [#allocation4], 4294963200 }
  0x98   :  { %302 = vsyncpa [#allocation3], 1 }
  0x99   :  { %303 = vsyncpa [#allocation4], 1 }

</bundles_post_ra>
